<compile_context>
chip_gen: v6e
topology: v6e:2x2x1
jax: 0.10.0
libtpu: 0.0.40
codegen_flags: <defaults>
</compile_context>

<pallas_src>
import jax
import jax.numpy as jnp
from jax.experimental import pallas as pl
from jax.experimental.pallas import tpu as pltpu

INPUT_SIZE = 10
HIDDEN = 128
NUM_ALGOS = 5
NUM_ACTIONS = 4
NUM_IDX = 2

K_PAD = 16                       # contraction dim padded (10 features + 1 bias col + 5 zeros)
GATES = 3 * HIDDEN               # pruned gate order: [i, g, o]  (f is dead since c0 == 0)
HEAD_OUT = 128                   # 5 + 4 + 2 = 11 real head columns, zero-padded to 128


def _round_up(n, m):
    return ((n + m - 1) // m) * m


def sorting_lstm_kernel(x_ref, w_gates_ref, w_head_ref, b_head_ref, out_ref):
    # x_ref: (TB, K_PAD) bf16  (col 10 is a ones column carrying the folded gate bias)
    # gates = [x, 1, 0...] @ [[W_ih^T]; [b_ih + b_hh]; [0]]  for gates [i, g, o]
    gates = jnp.dot(x_ref[...], w_gates_ref[...],
                    preferred_element_type=jnp.float32)            # (TB, 3H) f32
    i = jax.nn.sigmoid(gates[:, 0 * HIDDEN:1 * HIDDEN])
    g = jnp.tanh(gates[:, 1 * HIDDEN:2 * HIDDEN])
    o = jax.nn.sigmoid(gates[:, 2 * HIDDEN:3 * HIDDEN])
    # c1 = f*c0 + i*g = i*g (c0 == 0);  h1 = o * tanh(c1)
    h = (o * jnp.tanh(i * g)).astype(jnp.bfloat16)                 # (TB, H)
    # fused heads: one lane-dense (TB, 128) store, real columns [0:11)
    out_ref[...] = (jnp.dot(h, w_head_ref[...],
                            preferred_element_type=jnp.float32) + b_head_ref[...])


def sorting_lstm_forward(x, kparams, tb=512):
    B = x.shape[0]
    TB = min(tb, _round_up(B, 8))            # tile fits VMEM comfortably on v5e/v6e/v7x
    Bp = _round_up(B, TB)

    # pack x: [features | 1 (bias col) | zero pad], pad batch to a multiple of TB
    xk = jnp.concatenate(
        [x.astype(jnp.float32),
         jnp.ones((B, 1), jnp.float32),
         jnp.zeros((B, K_PAD - INPUT_SIZE - 1), jnp.float32)], axis=1)
    xk = jnp.pad(xk, ((0, Bp - B), (0, 0))).astype(jnp.bfloat16)

    grid = (Bp // TB,)
    fused = pl.pallas_call(
        sorting_lstm_kernel,
        out_shape=jax.ShapeDtypeStruct((Bp, HEAD_OUT), jnp.float32),
        grid_spec=pltpu.PrefetchScalarGridSpec(
            num_scalar_prefetch=0,
            grid=grid,
            in_specs=[
                pl.BlockSpec((TB, K_PAD), lambda i: (i, 0)),        # streamed per tile
                pl.BlockSpec((K_PAD, GATES), lambda i: (0, 0)),     # VMEM-resident weights
                pl.BlockSpec((HIDDEN, HEAD_OUT), lambda i: (0, 0)),
                pl.BlockSpec((1, HEAD_OUT), lambda i: (0, 0)),
            ],
            out_specs=pl.BlockSpec((TB, HEAD_OUT), lambda i: (i, 0)),
        ),
        compiler_params=pltpu.CompilerParams(
            dimension_semantics=("parallel",)),
        cost_estimate=pl.CostEstimate(
            flops=2 * Bp * (K_PAD * GATES + HIDDEN * HEAD_OUT),
            transcendentals=4 * Bp * HIDDEN,
            bytes_accessed=Bp * (K_PAD * 2 + HEAD_OUT * 4)
                           + (K_PAD * GATES + HIDDEN * HEAD_OUT) * 2
                           + HEAD_OUT * 4),
    )(xk, kparams["w_gates"], kparams["w_head"], kparams["b_head"])

    fused = fused[:B]
    a0, a1 = NUM_ALGOS, NUM_ALGOS + NUM_ACTIONS
    return fused[:, :a0], fused[:, a0:a1], fused[:, a1:a1 + NUM_IDX]


# ----------------------------- parameters & references -----------------------------

def init_raw_params(key):
    """PyTorch-layout parameters, uniform(-1/sqrt(H), 1/sqrt(H)) like nn.LSTM/nn.Linear."""
    bound = 1.0 / float(jnp.sqrt(HIDDEN))
    keys = jax.random.split(key, 10)
    u = lambda k_, shape: jax.random.uniform(k_, shape, jnp.float32, -bound, bound)
    return dict(
        w_ih=u(keys[0], (4 * HIDDEN, INPUT_SIZE)),   # gate order [i, f, g, o]
        b_ih=u(keys[1], (4 * HIDDEN,)),
        w_hh=u(keys[2], (4 * HIDDEN, HIDDEN)),       # multiplied by h0 == 0
        b_hh=u(keys[3], (4 * HIDDEN,)),
        w_algo=u(keys[4], (NUM_ALGOS, HIDDEN)),   b_algo=u(keys[5], (NUM_ALGOS,)),
        w_act=u(keys[6], (NUM_ACTIONS, HIDDEN)),  b_act=u(keys[7], (NUM_ACTIONS,)),
        w_idx=u(keys[8], (NUM_IDX, HIDDEN)),      b_idx=u(keys[9], (NUM_IDX,)),
    )


def preprocess_params(raw):
    """Kernel layout: pruned+padded gate weight (bias folded), fused padded head weight."""
    H = HIDDEN
    w_ih_igo = jnp.concatenate(
        [raw["w_ih"][0:H], raw["w_ih"][2 * H:3 * H], raw["w_ih"][3 * H:4 * H]], axis=0)
    b_all = raw["b_ih"] + raw["b_hh"]
    b_igo = jnp.concatenate([b_all[0:H], b_all[2 * H:3 * H], b_all[3 * H:4 * H]])

    w_gates = jnp.zeros((K_PAD, GATES), jnp.float32)
    w_gates = w_gates.at[:INPUT_SIZE].set(w_ih_igo.T)
    w_gates = w_gates.at[INPUT_SIZE].set(b_igo)        # folded bias row (ones column of x)

    a0, a1 = NUM_ALGOS, NUM_ALGOS + NUM_ACTIONS
    w_head = jnp.zeros((H, HEAD_OUT), jnp.float32)
    w_head = w_head.at[:, 0:a0].set(raw["w_algo"].T)
    w_head = w_head.at[:, a0:a1].set(raw["w_act"].T)
    w_head = w_head.at[:, a1:a1 + NUM_IDX].set(raw["w_idx"].T)

    b_head = jnp.zeros((1, HEAD_OUT), jnp.float32)
    b_head = b_head.at[0, 0:a0].set(raw["b_algo"])
    b_head = b_head.at[0, a0:a1].set(raw["b_act"])
    b_head = b_head.at[0, a1:a1 + NUM_IDX].set(raw["b_idx"])

    return dict(w_gates=w_gates.astype(jnp.bfloat16),
                w_head=w_head.astype(jnp.bfloat16),
                b_head=b_head)


def reference_torch_forward(x, raw):
    """Full unsimplified f32 single-step LSTM + heads (matches torch semantics, h0=c0=0)."""
    H = HIDDEN
    B = x.shape[0]
    h0 = jnp.zeros((B, H), jnp.float32)
    c0 = jnp.zeros((B, H), jnp.float32)
    gates = x @ raw["w_ih"].T + raw["b_ih"] + h0 @ raw["w_hh"].T + raw["b_hh"]
    i = jax.nn.sigmoid(gates[:, 0:H])
    f = jax.nn.sigmoid(gates[:, H:2 * H])
    g = jnp.tanh(gates[:, 2 * H:3 * H])
    o = jax.nn.sigmoid(gates[:, 3 * H:4 * H])
    h1 = o * jnp.tanh(f * c0 + i * g)
    return (h1 @ raw["w_algo"].T + raw["b_algo"],
            h1 @ raw["w_act"].T + raw["b_act"],
            h1 @ raw["w_idx"].T + raw["b_idx"])


def reference_mirror(x, kparams):
    """Pure-JAX mirror of the exact kernel math (bf16 operands, f32 accumulation)."""
    B = x.shape[0]
    xk = jnp.concatenate(
        [x.astype(jnp.float32), jnp.ones((B, 1), jnp.float32),
         jnp.zeros((B, K_PAD - INPUT_SIZE - 1), jnp.float32)], axis=1).astype(jnp.bfloat16)
    gates = jnp.dot(xk, kparams["w_gates"], preferred_element_type=jnp.float32)
    i = jax.nn.sigmoid(gates[:, :HIDDEN])
    g = jnp.tanh(gates[:, HIDDEN:2 * HIDDEN])
    o = jax.nn.sigmoid(gates[:, 2 * HIDDEN:])
    h = (o * jnp.tanh(i * g)).astype(jnp.bfloat16)
    fused = jnp.dot(h, kparams["w_head"],
                    preferred_element_type=jnp.float32) + kparams["b_head"]
    a0, a1 = NUM_ALGOS, NUM_ALGOS + NUM_ACTIONS
    return fused[:, :a0], fused[:, a0:a1], fused[:, a1:a1 + NUM_IDX]


if __name__ == "__main__":
    key = jax.random.PRNGKey(0)
    pkey, xkey = jax.random.split(key)
    raw = init_raw_params(pkey)
    kparams = preprocess_params(raw)

    B = 8
    x = jax.random.normal(xkey, (B, INPUT_SIZE), jnp.float32)

    out = jax.jit(sorting_lstm_forward)(x, kparams)
    out = jax.block_until_ready(out)

    mirror = reference_mirror(x, kparams)
    full = reference_torch_forward(x, raw)
    for o, m, r in zip(out, mirror, full):
        assert o.shape == r.shape and o.dtype == jnp.float32
        # kernel vs identical-math JAX reference (tight)
        assert jnp.allclose(o, m, atol=1e-4, rtol=1e-4)
        # kernel vs full f32 unsimplified LSTM (loose, accounts for bf16 operands)
        assert jnp.allclose(o, r, atol=5e-2, rtol=0.0)

    print("KERNEL_OK")
</pallas_src>

<mosaic_0001>
module attributes {stable_mosaic.version = 11 : i64} {
  func.func @sorting_lstm_kernel(%arg0: i32, %arg1: memref<8x16xbf16, #tpu.memory_space<vmem>>, %arg2: memref<16x384xbf16, #tpu.memory_space<vmem>>, %arg3: memref<128x128xbf16, #tpu.memory_space<vmem>>, %arg4: memref<1x128xf32, #tpu.memory_space<vmem>>, %arg5: memref<8x128xf32, #tpu.memory_space<vmem>>) attributes {dimension_semantics = [#tpu.dimension_semantics<parallel>], iteration_bounds = array<i64: 1>, scalar_prefetch = 0 : i64, scratch_operands = 0 : i64, tpu.core_type = #tpu.core_type<tc>, window_params = [{transform_indices = @transform_0, window_bounds = array<i64: 8, 16>}, {pipeline_mode = #tpu.pipeline_mode<synchronous>, transform_indices = @transform_1, window_bounds = array<i64: 16, 384>}, {pipeline_mode = #tpu.pipeline_mode<synchronous>, transform_indices = @transform_2, window_bounds = array<i64: 128, 128>}, {pipeline_mode = #tpu.pipeline_mode<synchronous>, transform_indices = @transform_3, window_bounds = array<i64: 1, 128>}, {transform_indices = @transform_4, window_bounds = array<i64: 8, 128>}]} {
    %c0 = arith.constant 0 : index
    %c0_0 = arith.constant 0 : index
    %0 = vector.load %arg1[%c0, %c0_0] : memref<8x16xbf16, #tpu.memory_space<vmem>>, vector<8x16xbf16>
    %c0_1 = arith.constant 0 : index
    %c0_2 = arith.constant 0 : index
    %1 = vector.load %arg2[%c0_1, %c0_2] : memref<16x384xbf16, #tpu.memory_space<vmem>>, vector<16x384xbf16>
    %cst = arith.constant dense<0.000000e+00> : vector<8x384xf32>
    %2 = tpu.matmul %0, %1, %cst {dimension_numbers = #tpu.dot_dimension_numbers<[1], [0], [0], [1], [0, 0, 1, 1], [], []>} : vector<8x16xbf16>, vector<16x384xbf16>, vector<8x384xf32> -> vector<8x384xf32>
    %3 = vector.extract_strided_slice %2 {offsets = [0, 0], sizes = [8, 128], strides = [1, 1]} : vector<8x384xf32> to vector<8x128xf32>
    %4 = arith.negf %3 : vector<8x128xf32>
    %5 = math.exp %4 : vector<8x128xf32>
    %cst_3 = arith.constant 1.000000e+00 : f32
    %6 = vector.broadcast %cst_3 : f32 to vector<8x128xf32>
    %7 = arith.addf %6, %5 : vector<8x128xf32>
    %8 = arith.divf %6, %7 : vector<8x128xf32>
    %9 = vector.extract_strided_slice %2 {offsets = [0, 128], sizes = [8, 128], strides = [1, 1]} : vector<8x384xf32> to vector<8x128xf32>
    %10 = math.tanh %9 : vector<8x128xf32>
    %11 = vector.extract_strided_slice %2 {offsets = [0, 256], sizes = [8, 128], strides = [1, 1]} : vector<8x384xf32> to vector<8x128xf32>
    %12 = arith.negf %11 : vector<8x128xf32>
    %13 = math.exp %12 : vector<8x128xf32>
    %cst_4 = arith.constant 1.000000e+00 : f32
    %14 = vector.broadcast %cst_4 : f32 to vector<8x128xf32>
    %15 = arith.addf %14, %13 : vector<8x128xf32>
    %16 = arith.divf %14, %15 : vector<8x128xf32>
    %17 = arith.mulf %8, %10 : vector<8x128xf32>
    %18 = math.tanh %17 : vector<8x128xf32>
    %19 = arith.mulf %16, %18 : vector<8x128xf32>
    %20 = arith.truncf %19 : vector<8x128xf32> to vector<8x128xbf16>
    %c0_5 = arith.constant 0 : index
    %c0_6 = arith.constant 0 : index
    %21 = vector.load %arg3[%c0_5, %c0_6] : memref<128x128xbf16, #tpu.memory_space<vmem>>, vector<128x128xbf16>
    %cst_7 = arith.constant dense<0.000000e+00> : vector<8x128xf32>
    %22 = tpu.matmul %20, %21, %cst_7 {dimension_numbers = #tpu.dot_dimension_numbers<[1], [0], [0], [1], [0, 0, 1, 1], [], []>} : vector<8x128xbf16>, vector<128x128xbf16>, vector<8x128xf32> -> vector<8x128xf32>
    %c0_8 = arith.constant 0 : index
    %c0_9 = arith.constant 0 : index
    %23 = vector.load %arg4[%c0_8, %c0_9] : memref<1x128xf32, #tpu.memory_space<vmem>>, vector<1x128xf32>
    %24 = vector.broadcast %23 : vector<1x128xf32> to vector<8x128xf32>
    %25 = arith.addf %22, %24 : vector<8x128xf32>
    %c0_10 = arith.constant 0 : index
    %c0_11 = arith.constant 0 : index
    %26 = vector.load %arg5[%c0_10, %c0_11] : memref<8x128xf32, #tpu.memory_space<vmem>>, vector<8x128xf32>
    tpu.vector_store %arg5[%c0_10, %c0_11], %25 {strides = array<i32>} : memref<8x128xf32, #tpu.memory_space<vmem>>, vector<8x128xf32>,
    return
  }
  func.func @transform_0(%arg0: i32) -> (i32, i32) {
    %c0_i32 = arith.constant 0 : i32
    %c0_i32_0 = arith.constant 0 : i32
    return %arg0, %c0_i32 : i32, i32
  }
  func.func @transform_1(%arg0: i32) -> (i32, i32) {
    %c0_i32 = arith.constant 0 : i32
    %c0_i32_0 = arith.constant 0 : i32
    %c0_i32_1 = arith.constant 0 : i32
    return %c0_i32, %c0_i32_0 : i32, i32
  }
  func.func @transform_2(%arg0: i32) -> (i32, i32) {
    %c0_i32 = arith.constant 0 : i32
    %c0_i32_0 = arith.constant 0 : i32
    %c0_i32_1 = arith.constant 0 : i32
    return %c0_i32, %c0_i32_0 : i32, i32
  }
  func.func @transform_3(%arg0: i32) -> (i32, i32) {
    %c0_i32 = arith.constant 0 : i32
    %c0_i32_0 = arith.constant 0 : i32
    %c0_i32_1 = arith.constant 0 : i32
    return %c0_i32, %c0_i32_0 : i32, i32
  }
  func.func @transform_4(%arg0: i32) -> (i32, i32) {
    %c0_i32 = arith.constant 0 : i32
    %c0_i32_0 = arith.constant 0 : i32
    return %arg0, %c0_i32 : i32, i32
  }
}

</mosaic_0001>

<bundles_post_ra>
// kernel: sorting_lstm_forward.1
= control target key start
LH: loop header
LB: loop body
LE: loop exit
PB: predicated region body
PF: predicated region fallthrough
CT: control target
= control target key end

     0   :  { %9 = vsyncpa [#allocation3], 0  ;;  %s377_s15 = smov [#allocation2]   ;;  %s429_s0 = inlined_call_operand.vmem [shape: bf16[8,16], index: 0, kind: input, shape index: {}]   ;;  %s430_s1 = inlined_call_operand.vmem [shape: bf16[16,384], index: 1, kind: input, shape index: {}]   ;;  %s431_s2 = inlined_call_operand.hbm [shape: bf16[128,128], index: 2, kind: input, shape index: {}]   ;;  %s432_s3 = inlined_call_operand.vmem [shape: f32[1,128], index: 3, kind: input, shape index: {}]   ;;  %s433_s4 = inlined_call_operand.vmem [shape: f32[8,128], index: 4, kind: output, shape index: {}]  }
   0x1   :  { %s19_s16 = sshll.u32 %s377_s15, 4  ;;  %s20_s16 = int_to_ptr.vmem [resolvable:$true] %s19_s16 }
   0x2   :  { %s363_s17 = scalar_lea.vmem %s20_s16, 1024  ;;  %p368_p1 = scmp.lt.s32.totalorder %s20_s16, %s20_s16 }
   0x3   :  { %p364_p0 = scmp.ne.s32.totalorder %s20_s16, %s363_s17  ;;  %p369_p2 = scmp.lt.s32.totalorder %s363_s17, %s363_s17 }
   0x5   :  { %p370_p3 = por %p369_p2, %p368_p1 }
   0x7   :  { %p371_p4 = pnand %p370_p3, %p364_p0 }
   0x9   :  { %374 = shalt.err (!%p371_p4)
}
   0xa   :  { %s378_s18 = smov 64   ;;  %s379_s19 = smov 4  }
   0xb   :  { %25 = dma.hbm_to_vmem [thread:$0]  %s431_s2, 1024, %s20_s16, [#allocation3], %s378_s18, %s378_s18, %s379_s19  }
   0xc   :  { %375 = dma.done.wait [#allocation3], 1024  }
   0xd   :  { %376 = vsyncadd [#allocation3], 4294966272  ;;  %v380_v0 = vmov 0   ;;  %v381_v1 = vmov 0.0   ;;  %vm382_vm0 = vmmov 0   ;;  %vm53_vm1 = vcmask 130048  }
   0xe   :  { %89 = vmatprep.mubr.bf16.mxu1 %v380_v0  ;;  %305 = vmatprep.subr.bf16.mxu0 %v381_v1  ;;  %v331_v2 = vld [vmem:[%s430_s1 + $0x4] ss:$12 sps:$4 sm:$0xff]   ;;  %v333_v3 = vld [vmem:[%s430_s1] ss:$12 sps:$4 sm:$0xff]   ;;  %v334_v5 = vld [vmem:[%s430_s1 + $0x8] ss:$12 sps:$4 sm:$0xff]  }
   0xf   :  { %321 = vmatprep.mubr.msk.bf16.mxu0 %vm382_vm0, %v381_v1  ;;  %v32_v4 = vld [vmem:[%s429_s0] sm:$0xf]  ;;  %71 = vmatprep.subr.bf16.mxu1 %v331_v2  ;;  %v335_v6 = vld [vmem:[#allocation2 + $0x38] sm:$0xff]   ;;  %v336_v7 = vld [vmem:[#allocation2 + $0x30] sm:$0xff]  }
  0x10   :  { %72 = vmatpush1.bf16.msra.mxu1 %v333_v3  ;;  %306 = vmatpush3.bf16.msra.mxu0 %v335_v6  ;;  %v337_v8 = vld [vmem:[#allocation2 + $0x28] sm:$0xff]   ;;  %v338_v9 = vld [vmem:[#allocation2 + $0x20] sm:$0xff]   ;;  %v339_v10 = vld [vmem:[#allocation2 + $0x18] sm:$0xff]  }
  0x11   :  { %299 = vmatprep.subr.bf16.mxu1 %v381_v1  ;;  %307 = vmatprep.subr.bf16.mxu0 %v381_v1  ;;  %v340_v11 = vld [vmem:[#allocation2 + $0x10] sm:$0xff]   ;;  %v341_v12 = vld [vmem:[#allocation2 + $0x8] sm:$0xff]   ;;  %v342_v13 = vld [vmem:[#allocation2] sm:$0xff]  }
  0x12   :  { %v279_v35 = vld [vmem:[%s432_s3] ss:$0 sm:$0xff] }
  0x13   :  { %275 = vmatmul.mubr.msk.bf16.vlgmr.msra.gmra.mxu1 %vm53_vm1, %v32_v4 }
  0x14   :  { %300 = vmatpush3.bf16.msra.mxu1 %v334_v5  ;;  %301 = vmatprep.mubr.msk.bf16.mxu1 %vm382_vm0, %v381_v1 }
  0x15   :  { %308 = vmatpush3.bf16.msra.mxu0 %v336_v7 }
  0x16   :  { %309 = vmatprep.subr.bf16.mxu0 %v381_v1 }
  0x19   :  { %310 = vmatpush3.bf16.msra.mxu0 %v337_v8 }
  0x1a   :  { %311 = vmatprep.subr.bf16.mxu0 %v381_v1 }
  0x1b   :  { %302 = vmatmul.mubr.msk.bf16.vlgmr.msra.gmra.mxu1 %vm53_vm1, %v32_v4 }
  0x1d   :  { %312 = vmatpush3.bf16.msra.mxu0 %v338_v9 }
  0x1e   :  { %313 = vmatprep.subr.bf16.mxu0 %v381_v1 }
  0x21   :  { %314 = vmatpush3.bf16.msra.mxu0 %v339_v10 }
  0x22   :  { %315 = vmatprep.subr.bf16.mxu0 %v381_v1 }
  0x25   :  { %316 = vmatpush3.bf16.msra.mxu0 %v340_v11 }
  0x26   :  { %317 = vmatprep.subr.bf16.mxu0 %v381_v1 }
  0x29   :  { %318 = vmatpush3.bf16.msra.mxu0 %v341_v12 }
  0x2a   :  { %319 = vmatprep.subr.bf16.mxu0 %v381_v1 }
  0x2d   :  { %320 = vmatpush3.bf16.msra.mxu0 %v342_v13 }
  0xd3   :  { %v91_v14 = vpop.f32.mrf.mxu1 }
  0xd4   :  { %v277_v15 = vmul.f32 -1.442695, %v91_v14 }
  0xd5   :  { %v93_v16 = vpop.f32.mrf.mxu1 }
  0xd6   :  { %343 = vpow2.f32 %v277_v15 }
  0xd7   :  { %v95_v17 = vpop.f32.mrf.mxu1 }
  0xd9   :  { %v96_v18 = vpop.f32.mrf.mxu1 }
  0xdb   :  { %v132_v19 = vpop.f32.mrf.mxu1 }
  0xdc   :  { %v278_v20 = vmul.f32 -1.442695, %v132_v19 }
  0xdd   :  { %v303_v21 = vpop.f32.mrf.mxu1 }
  0xde   :  { %345 = vpow2.f32 %v278_v20 }
  0xdf   :  { %v135_v22 = vpop.f32.mrf.mxu1  ;;  %347 = vtanh.f32 %v93_v16 }
  0xe1   :  { %v304_v23 = vpop.f32.mrf.mxu1 }
  0xe3   :  { %v344_v24 = vpop.eup %343 }
  0xe4   :  { %v141_v25 = vadd.f32 1.0, %v344_v24 }
  0xe6   :  { %349 = vrcp.f32 %v141_v25 }
  0xeb   :  { %v346_v26 = vpop.eup %345 }
  0xec   :  { %v148_v27 = vadd.f32 1.0, %v346_v26  ;;  %v348_v28 = vpop.eup %347 }
  0xee   :  { %351 = vrcp.f32 %v148_v27 }
  0xf3   :  { %v350_v29 = vpop.eup %349 }
  0xf4   :  { %v151_v30 = vmul.f32 %v350_v29, %v348_v28 }
  0xf6   :  { %353 = vtanh.f32 %v151_v30 }
  0xfb   :  { %v352_v31 = vpop.eup %351 }
 0x103   :  { %v354_v32 = vpop.eup %353 }
 0x104   :  { %v153_v33 = vmul.f32 %v354_v32, %v352_v31 }
 0x106   :  { %v154_v34 = vpack.c.bf16 %v153_v33, %v153_v33 }
 0x108   :  { %322 = vmatmul.mubr.bf16.vlgmr.msra.gmra.mxu0 %v154_v34 }
 0x1c8   :  { %v260_v36 = vpop.f32.mrf.mxu0 }
 0x1c9   :  { %v261_v37 = vadd.f32 %v279_v35, %v260_v36 }
 0x1ca   :  { %v323_v38 = vpop.f32.mrf.mxu0 }
 0x1cb   :  { %266 = vst [vmem:[%s433_s4] sm:$0xff] %v261_v37 }
 0x1cc   :  { %v263_v39 = vpop.f32.mrf.mxu0 }
 0x1ce   :  { %v324_v40 = vpop.f32.mrf.mxu0 }
 0x1cf   :  { %271 = vsyncpa [#allocation3], 1 }

</bundles_post_ra>
